<compile_context>
chip_gen: v5e
topology: v5e:2x2
jax: 0.10.0
libtpu: 0.0.40
codegen_flags: <defaults>
</compile_context>

<pallas_src>
import functools

import jax
import jax.numpy as jnp
from jax.experimental import pallas as pl
from jax.experimental.pallas import tpu as pltpu


def _round_up(x, m):
    return ((x + m - 1) // m) * m


def _batch_tiling(batch):
    """Pick (batch tile, padded batch): large uniform tiles, >=2 grid steps
    once the batch is big enough to matter, never one giant tile."""
    tb = min(128, _round_up(batch, 8))
    bp = _round_up(batch, tb)
    if batch >= 16 and bp // tb < 2:
        tb = max(8, tb // 2)
        bp = _round_up(batch, tb)
    return tb, bp


def _char_cnn_kernel(max_s, v_pad, t_pad, idx_ref, w_ref, mask_ref, bias_ref,
                     out_ref):
    """Fused Char_CNN forward for one batch tile.

    idx_ref:  (TB, max_s, Tp) int32  pre-shifted ids: idx[b,k,t] = char[b,t+k] + k*Vpad
    w_ref:    (max_s*Vpad, n*F) bf16 embedding table folded into N-concat conv weights
    mask_ref: (Tp, n*F)  f32         additive time-validity mask (0 valid, -1e30 pad)
    bias_ref: (1, n*F)   f32         all conv biases, concatenated
    out_ref:  (TB, n*F)  f32         output block
    """
    tb = out_ref.shape[0]
    n_f = out_ref.shape[1]
    k_dim = max_s * v_pad

    idx = idx_ref[...]                                        # (TB, max_s, Tp)
    j = jax.lax.broadcasted_iota(jnp.int32, (1, 1, k_dim), 2)

    # Multi-hot im2col: X[b, t, k*Vpad + v] = (char[b, t+k] == v).
    x = None
    for k in range(max_s):                                    # static tap loop
        tgt = idx[:, k, :][:, :, None]                        # (TB, Tp, 1)
        oh = jnp.where(j == tgt, 1.0, 0.0)                    # (TB, Tp, K) f32
        x = oh if x is None else x + oh
    x = x.astype(jnp.bfloat16).reshape(tb * t_pad, k_dim)

    # One MXU dot per tile: gather + all taps + all branches at once.
    acc = jnp.dot(x, w_ref[...], preferred_element_type=jnp.float32)
    acc = acc.reshape(tb, t_pad, n_f) + mask_ref[...][None, :, :]

    m = jnp.max(acc, axis=1)                                  # MaxPool1d over time
    # relu(max(x) + b) == max(relu(x + b))  (ReLU monotone, bias const over t)
    out_ref[...] = jnp.maximum(m + bias_ref[...], 0.0)


def char_cnn_forward(input_titles, w_cat, mask_add, bias_fused, *,
                     max_s, v_pad, t_pad):
    b, l = input_titles.shape
    n_f = w_cat.shape[1]
    tb, bp = _batch_tiling(b)

    # Wrapper-side index im2col (dense DMA rows, tap offset folded in).
    idx = input_titles.astype(jnp.int32)
    idx = jnp.pad(idx, ((0, bp - b), (0, t_pad + max_s - 1 - l)))
    idx_shift = jnp.stack(
        [idx[:, k:k + t_pad] + k * v_pad for k in range(max_s)], axis=1)

    kernel = functools.partial(_char_cnn_kernel, max_s, v_pad, t_pad)
    out = pl.pallas_call(
        kernel,
        out_shape=jax.ShapeDtypeStruct((bp, n_f), jnp.float32),
        grid=(bp // tb,),
        in_specs=[
            pl.BlockSpec((tb, max_s, t_pad), lambda i: (i, 0, 0)),  # indices
            pl.BlockSpec(w_cat.shape, lambda i: (0, 0)),            # folded weights
            pl.BlockSpec(mask_add.shape, lambda i: (0, 0)),         # time mask
            pl.BlockSpec(bias_fused.shape, lambda i: (0, 0)),       # fused bias
        ],
        out_specs=pl.BlockSpec((tb, n_f), lambda i: (i, 0)),
        compiler_params=pltpu.CompilerParams(
            dimension_semantics=("parallel",),        # batch tiles shard on v7x TCs
            vmem_limit_bytes=32 * 1024 * 1024),       # safe vs v7x's 64 MiB VMEM
    )(idx_shift, w_cat, mask_add, bias_fused)
    return out[:b]


class CharCNNPallas:
    """JAX/Pallas port of the PyTorch Char_CNN module (single fused kernel)."""

    def __init__(self, char_embedding_dim, char_num, filter_num, filter_sizes,
                 maximum_title_length, key):
        self.E = char_embedding_dim
        self.V = char_num
        self.F = filter_num
        self.filter_sizes = tuple(filter_sizes)
        self.L = maximum_title_length
        n = len(self.filter_sizes)
        n_f = n * self.F

        self.max_s = max(self.filter_sizes)
        self.t_pad = _round_up(self.L - min(self.filter_sizes) + 1, 8)
        self.v_pad = _round_up(self.V, 64)

        keys = jax.random.split(key, 1 + 2 * n)
        # Embedding table (char_num, E) — deterministic synthetic init.
        self.emb_table = 0.1 * jax.random.normal(
            keys[0], (self.V, self.E), jnp.float32)
        # Conv params, PyTorch layout: weight (F, E, size), bias (F,).
        self.conv_w = []
        self.conv_b = []
        for i, size in enumerate(self.filter_sizes):
            self.conv_w.append(0.1 * jax.random.normal(
                keys[1 + 2 * i], (self.F, self.E, size), jnp.float32))
            self.conv_b.append(0.1 * jax.random.normal(
                keys[2 + 2 * i], (self.F,), jnp.float32))

        # --- Hoisted kernel-layout work (done once, not per forward) ---
        # 1) N-concatenate branch weights per tap, zero-padded: (max_s, E, n*F).
        w_all = jnp.zeros((self.max_s, self.E, n_f), jnp.float32)
        for i, (size, w) in enumerate(zip(self.filter_sizes, self.conv_w)):
            wk = jnp.transpose(w, (2, 1, 0))                     # (size, E, F)
            w_all = w_all.at[:size, :, i * self.F:(i + 1) * self.F].set(wk)
        # 2) Fold the embedding table into the weights: (max_s, V, n*F).
        w_eff = jnp.einsum('ve,kef->kvf', self.emb_table, w_all,
                           precision=jax.lax.Precision.HIGHEST)
        w_eff = jnp.pad(w_eff, ((0, 0), (0, self.v_pad - self.V), (0, 0)))
        self.w_cat = w_eff.reshape(self.max_s * self.v_pad, n_f).astype(
            jnp.bfloat16)
        # 3) Additive per-branch time-validity mask (Tp, n*F).
        t = jnp.arange(self.t_pad)[:, None]
        cols = [jnp.where(t < (self.L - size + 1), 0.0, -1e30) *
                jnp.ones((1, self.F)) for size in self.filter_sizes]
        self.mask_add = jnp.concatenate(cols, axis=1).astype(jnp.float32)
        # 4) Fused biases (1, n*F).
        self.bias_fused = jnp.concatenate(self.conv_b).reshape(1, n_f)

    def __call__(self, input_titles):
        return char_cnn_forward(
            input_titles, self.w_cat, self.mask_add, self.bias_fused,
            max_s=self.max_s, v_pad=self.v_pad, t_pad=self.t_pad)

    # Pure-f32 reference in PyTorch op order (embedding -> conv -> ReLU -> max).
    def reference(self, input_titles):
        emb = jnp.take(self.emb_table, input_titles, axis=0)     # (B, L, E)
        outs = []
        for size, w, b in zip(self.filter_sizes, self.conv_w, self.conv_b):
            T = self.L - size + 1
            acc = jnp.zeros((emb.shape[0], T, self.F), jnp.float32)
            for k in range(size):
                acc = acc + jnp.einsum(
                    'ble,ef->blf', emb[:, k:k + T, :], w[:, :, k].T,
                    precision=jax.lax.Precision.HIGHEST)
            y = jnp.maximum(acc + b[None, None, :], 0.0)         # bias + ReLU
            outs.append(jnp.max(y, axis=1))                      # MaxPool1d
        return jnp.concatenate(outs, axis=1)


if __name__ == "__main__":
    # Small, module-consistent shapes.
    char_embedding_dim = 32
    char_num = 50
    filter_num = 16
    filter_sizes = (2, 3, 4)
    maximum_title_length = 16
    batch = 2

    key = jax.random.PRNGKey(0)
    k_params, k_titles = jax.random.split(key)

    model = CharCNNPallas(char_embedding_dim, char_num, filter_num,
                          filter_sizes, maximum_title_length, k_params)

    input_titles = jax.random.randint(
        k_titles, (batch, maximum_title_length), 0, char_num, dtype=jnp.int32)

    out = jax.block_until_ready(model(input_titles))
    ref = jax.block_until_ready(model.reference(input_titles))

    assert out.shape == (batch, filter_num * len(filter_sizes)), out.shape
    # Kernel uses bf16 folded weights (one-hot selection is exact); vs the
    # pure-f32 reference the error is bf16 rounding of the folded weights.
    assert jnp.allclose(out, ref, rtol=1e-2, atol=1e-2), (
        float(jnp.max(jnp.abs(out - ref))))

    print("KERNEL_OK")
</pallas_src>

<mosaic_0001>
module attributes {stable_mosaic.version = 11 : i64} {
  func.func @_char_cnn_kernel(%arg0: i32, %arg1: memref<8x4x16xi32, #tpu.memory_space<vmem>>, %arg2: memref<256x48xbf16, #tpu.memory_space<vmem>>, %arg3: memref<16x48xf32, #tpu.memory_space<vmem>>, %arg4: memref<1x48xf32, #tpu.memory_space<vmem>>, %arg5: memref<8x48xf32, #tpu.memory_space<vmem>>) attributes {dimension_semantics = [#tpu.dimension_semantics<parallel>], iteration_bounds = array<i64: 1>, scalar_prefetch = 0 : i64, scratch_operands = 0 : i64, tpu.core_type = #tpu.core_type<tc>, window_params = [{transform_indices = @transform_0, window_bounds = array<i64: 8, 4, 16>}, {pipeline_mode = #tpu.pipeline_mode<synchronous>, transform_indices = @transform_1, window_bounds = array<i64: 256, 48>}, {pipeline_mode = #tpu.pipeline_mode<synchronous>, transform_indices = @transform_2, window_bounds = array<i64: 16, 48>}, {pipeline_mode = #tpu.pipeline_mode<synchronous>, transform_indices = @transform_3, window_bounds = array<i64: 1, 48>}, {transform_indices = @transform_4, window_bounds = array<i64: 8, 48>}]} {
    %c0 = arith.constant 0 : index
    %c0_0 = arith.constant 0 : index
    %c0_1 = arith.constant 0 : index
    %0 = vector.load %arg1[%c0, %c0_0, %c0_1] : memref<8x4x16xi32, #tpu.memory_space<vmem>>, vector<8x4x16xi32>
    %1 = tpu.iota {dimensions = array<i32: 2>} : vector<1x1x256xi32>
    %2 = vector.extract_strided_slice %0 {offsets = [0, 0, 0], sizes = [8, 1, 16], strides = [1, 1, 1]} : vector<8x4x16xi32> to vector<8x1x16xi32>
    %3 = vector.shape_cast %2 : vector<8x1x16xi32> to vector<8x16xi32>
    %4 = vector.shape_cast %3 : vector<8x16xi32> to vector<8x16x1xi32>
    %5 = vector.broadcast %1 : vector<1x1x256xi32> to vector<8x16x256xi32>
    %6 = vector.broadcast %4 : vector<8x16x1xi32> to vector<8x16x256xi32>
    %7 = arith.cmpi eq, %5, %6 : vector<8x16x256xi32>
    %cst = arith.constant 1.000000e+00 : f32
    %cst_2 = arith.constant 0.000000e+00 : f32
    %8 = vector.broadcast %cst : f32 to vector<8x16x256xf32>
    %9 = vector.broadcast %cst_2 : f32 to vector<8x16x256xf32>
    %10 = arith.select %7, %8, %9 : vector<8x16x256xi1>, vector<8x16x256xf32>
    %11 = vector.extract_strided_slice %0 {offsets = [0, 1, 0], sizes = [8, 1, 16], strides = [1, 1, 1]} : vector<8x4x16xi32> to vector<8x1x16xi32>
    %12 = vector.shape_cast %11 : vector<8x1x16xi32> to vector<8x16xi32>
    %13 = vector.shape_cast %12 : vector<8x16xi32> to vector<8x16x1xi32>
    %14 = vector.broadcast %1 : vector<1x1x256xi32> to vector<8x16x256xi32>
    %15 = vector.broadcast %13 : vector<8x16x1xi32> to vector<8x16x256xi32>
    %16 = arith.cmpi eq, %14, %15 : vector<8x16x256xi32>
    %cst_3 = arith.constant 1.000000e+00 : f32
    %cst_4 = arith.constant 0.000000e+00 : f32
    %17 = vector.broadcast %cst_3 : f32 to vector<8x16x256xf32>
    %18 = vector.broadcast %cst_4 : f32 to vector<8x16x256xf32>
    %19 = arith.select %16, %17, %18 : vector<8x16x256xi1>, vector<8x16x256xf32>
    %20 = arith.addf %10, %19 : vector<8x16x256xf32>
    %21 = vector.extract_strided_slice %0 {offsets = [0, 2, 0], sizes = [8, 1, 16], strides = [1, 1, 1]} : vector<8x4x16xi32> to vector<8x1x16xi32>
    %22 = vector.shape_cast %21 : vector<8x1x16xi32> to vector<8x16xi32>
    %23 = vector.shape_cast %22 : vector<8x16xi32> to vector<8x16x1xi32>
    %24 = vector.broadcast %1 : vector<1x1x256xi32> to vector<8x16x256xi32>
    %25 = vector.broadcast %23 : vector<8x16x1xi32> to vector<8x16x256xi32>
    %26 = arith.cmpi eq, %24, %25 : vector<8x16x256xi32>
    %cst_5 = arith.constant 1.000000e+00 : f32
    %cst_6 = arith.constant 0.000000e+00 : f32
    %27 = vector.broadcast %cst_5 : f32 to vector<8x16x256xf32>
    %28 = vector.broadcast %cst_6 : f32 to vector<8x16x256xf32>
    %29 = arith.select %26, %27, %28 : vector<8x16x256xi1>, vector<8x16x256xf32>
    %30 = arith.addf %20, %29 : vector<8x16x256xf32>
    %31 = vector.extract_strided_slice %0 {offsets = [0, 3, 0], sizes = [8, 1, 16], strides = [1, 1, 1]} : vector<8x4x16xi32> to vector<8x1x16xi32>
    %32 = vector.shape_cast %31 : vector<8x1x16xi32> to vector<8x16xi32>
    %33 = vector.shape_cast %32 : vector<8x16xi32> to vector<8x16x1xi32>
    %34 = vector.broadcast %1 : vector<1x1x256xi32> to vector<8x16x256xi32>
    %35 = vector.broadcast %33 : vector<8x16x1xi32> to vector<8x16x256xi32>
    %36 = arith.cmpi eq, %34, %35 : vector<8x16x256xi32>
    %cst_7 = arith.constant 1.000000e+00 : f32
    %cst_8 = arith.constant 0.000000e+00 : f32
    %37 = vector.broadcast %cst_7 : f32 to vector<8x16x256xf32>
    %38 = vector.broadcast %cst_8 : f32 to vector<8x16x256xf32>
    %39 = arith.select %36, %37, %38 : vector<8x16x256xi1>, vector<8x16x256xf32>
    %40 = arith.addf %30, %39 : vector<8x16x256xf32>
    %41 = arith.truncf %40 : vector<8x16x256xf32> to vector<8x16x256xbf16>
    %42 = vector.shape_cast %41 : vector<8x16x256xbf16> to vector<128x256xbf16>
    %c0_9 = arith.constant 0 : index
    %c0_10 = arith.constant 0 : index
    %43 = vector.load %arg2[%c0_9, %c0_10] : memref<256x48xbf16, #tpu.memory_space<vmem>>, vector<256x48xbf16>
    %cst_11 = arith.constant dense<0.000000e+00> : vector<128x48xf32>
    %44 = tpu.matmul %42, %43, %cst_11 {dimension_numbers = #tpu.dot_dimension_numbers<[1], [0], [0], [1], [0, 0, 1, 1], [], []>} : vector<128x256xbf16>, vector<256x48xbf16>, vector<128x48xf32> -> vector<128x48xf32>
    %45 = vector.shape_cast %44 : vector<128x48xf32> to vector<8x16x48xf32>
    %c0_12 = arith.constant 0 : index
    %c0_13 = arith.constant 0 : index
    %46 = vector.load %arg3[%c0_12, %c0_13] : memref<16x48xf32, #tpu.memory_space<vmem>>, vector<16x48xf32>
    %47 = vector.shape_cast %46 : vector<16x48xf32> to vector<1x16x48xf32>
    %48 = vector.broadcast %47 : vector<1x16x48xf32> to vector<8x16x48xf32>
    %49 = arith.addf %45, %48 : vector<8x16x48xf32>
    %cst_14 = arith.constant dense<0xFF800000> : vector<8x48xf32>
    %50 = vector.multi_reduction <maximumf>, %49, %cst_14 [1] : vector<8x16x48xf32> to vector<8x48xf32>
    %c0_15 = arith.constant 0 : index
    %c0_16 = arith.constant 0 : index
    %51 = vector.load %arg4[%c0_15, %c0_16] : memref<1x48xf32, #tpu.memory_space<vmem>>, vector<1x48xf32>
    %52 = vector.broadcast %51 : vector<1x48xf32> to vector<8x48xf32>
    %53 = arith.addf %50, %52 : vector<8x48xf32>
    %cst_17 = arith.constant 0.000000e+00 : f32
    %54 = vector.broadcast %cst_17 : f32 to vector<8x48xf32>
    %55 = arith.maximumf %53, %54 : vector<8x48xf32>
    %c0_18 = arith.constant 0 : index
    %c0_19 = arith.constant 0 : index
    %56 = vector.load %arg5[%c0_18, %c0_19] : memref<8x48xf32, #tpu.memory_space<vmem>>, vector<8x48xf32>
    tpu.vector_store %arg5[%c0_18, %c0_19], %55 {strides = array<i32>} : memref<8x48xf32, #tpu.memory_space<vmem>>, vector<8x48xf32>,
    return
  }
  func.func @transform_0(%arg0: i32) -> (i32, i32, i32) {
    %c0_i32 = arith.constant 0 : i32
    %c0_i32_0 = arith.constant 0 : i32
    %c0_i32_1 = arith.constant 0 : i32
    return %arg0, %c0_i32, %c0_i32_0 : i32, i32, i32
  }
  func.func @transform_1(%arg0: i32) -> (i32, i32) {
    %c0_i32 = arith.constant 0 : i32
    %c0_i32_0 = arith.constant 0 : i32
    %c0_i32_1 = arith.constant 0 : i32
    return %c0_i32, %c0_i32_0 : i32, i32
  }
  func.func @transform_2(%arg0: i32) -> (i32, i32) {
    %c0_i32 = arith.constant 0 : i32
    %c0_i32_0 = arith.constant 0 : i32
    %c0_i32_1 = arith.constant 0 : i32
    return %c0_i32, %c0_i32_0 : i32, i32
  }
  func.func @transform_3(%arg0: i32) -> (i32, i32) {
    %c0_i32 = arith.constant 0 : i32
    %c0_i32_0 = arith.constant 0 : i32
    %c0_i32_1 = arith.constant 0 : i32
    return %c0_i32, %c0_i32_0 : i32, i32
  }
  func.func @transform_4(%arg0: i32) -> (i32, i32) {
    %c0_i32 = arith.constant 0 : i32
    %c0_i32_0 = arith.constant 0 : i32
    return %arg0, %c0_i32 : i32, i32
  }
}

</mosaic_0001>

<bundles_post_ra>
// kernel: tpu_custom_call.1
= control target key start
LH: loop header
LB: loop body
LE: loop exit
PB: predicated region body
PF: predicated region fallthrough
CT: control target
= control target key end

     0   :  { %v26_v0 = vlaneseq  ;;  %s2162_s0 = inlined_call_operand.vmem [shape: s32[8,4,16], index: 0, kind: input, shape index: {}]   ;;  %s2163_s1 = inlined_call_operand.vmem [shape: bf16[256,48], index: 1, kind: input, shape index: {}]   ;;  %s2164_s2 = inlined_call_operand.vmem [shape: f32[16,48], index: 2, kind: input, shape index: {}]   ;;  %s2165_s3 = inlined_call_operand.vmem [shape: f32[1,48], index: 3, kind: input, shape index: {}]   ;;  %s2166_s4 = inlined_call_operand.hbm [shape: f32[8,48], index: 4, kind: output, shape index: {}]  }
   0x1   :  { %v1470_v3 = vld [vmem:[%s2162_s0 + $0x8] sm:$0xf]  ;;  %v1475_v4 = vld [vmem:[%s2162_s0 + $0x4] sm:$0xf] }
   0x2   :  { %v1460_v1 = vshrl.u32 %v26_v0, 7 }
   0x4   :  { %1377 = vset.pattern.permute.xlu2 %v1460_v1  ;;  %1376 = vset.pattern.permute.xlu1 %v1460_v1  ;;  %v1465_v2 = vadd.s32 8, %v1460_v1 }
   0x5   :  { %9 = vsyncpa [#allocation3], 0  ;;  %v1481_v5 = vld [vmem:[%s2162_s0] sm:$0xf]  ;;  %v55_v6 = vperm.slane %v1470_v3, 0  ;;  %v42_v7 = vperm.slane %v1475_v4, 0 }
   0x6   :  { %1375 = vset.pattern.permute.xlu0 %v1465_v2  ;;  %v29_v8 = vperm.slane %v1481_v5, 0  ;;  %v1489_v9 = vld [vmem:[%s2162_s0 + $0x18] sm:$0xf]  ;;  %v1497_v11 = vld [vmem:[%s2162_s0 + $0x10] sm:$0xf]  ;;  %v223_v17 = vperm.slane %v1470_v3, 1 }
   0x7   :  { %v107_v10 = vperm.slane %v1489_v9, 0  ;;  %v449_v12 = vperm.slane %v1497_v11, 2  ;;  %v1503_v13 = vld [vmem:[%s2162_s0 + $0xc] sm:$0xf]  ;;  %v1508_v14 = vld [vmem:[%s2162_s0 + $0x14] sm:$0xf] }
   0x8   :  { %v68_v15 = vperm.slane %v1503_v13, 0  ;;  %v462_v16 = vperm.slane %v1508_v14, 2  ;;  %v94_v18 = vperm.slane %v1508_v14, 0  ;;  %v81_v19 = vperm.slane %v1497_v11, 0  ;;  %v1527_v20 = vld [vmem:[%s2162_s0 + $0x1c] sm:$0xf] }
   0x9   :  { %v120_v21 = vperm.slane %v1527_v20, 0  ;;  %v210_v22 = vperm.slane %v1475_v4, 1  ;;  %v197_v23 = vperm.slane %v1481_v5, 1  ;;  %v597_v24 = vperm.slane %v1481_v5, 3  ;;  %v1348_v61 = vld [vmem:[%s2163_s1 + $0x38] sm:$0xff]  ;;  %s1268_s16 = sshll.u32 %s2166_s4, 4  ;;  %s1269_s16 = int_to_ptr.hbm [resolvable:$true] %s1268_s16 }
   0xa   :  { %v610_v25 = vperm.slane %v1475_v4, 3  ;;  %v249_v26 = vperm.slane %v1497_v11, 1  ;;  %v675_v27 = vperm.slane %v1489_v9, 3  ;;  %v436_v28 = vperm.slane %v1503_v13, 2  ;;  %v1356_v62 = vld [vmem:[%s2163_s1 + $0x78] sm:$0xff]  ;;  %1357 = vmatpush.bf16.msra.mxu2 %v1348_v61  ;;  %1021 = vmatpush.bf16.msra.mxu0 %v1348_v61 }
   0xb   :  { %v397_v29 = vperm.slane %v1481_v5, 2  ;;  %v288_v30 = vperm.slane %v1527_v20, 1  ;;  %v649_v32 = vperm.slane %v1497_v11, 3  ;;  %v262_v35 = vperm.slane %v1508_v14, 1  ;;  %1365 = vmatpush.bf16.msra.mxu3 %v1356_v62  ;;  %1070 = vmatpush.bf16.msra.mxu1 %v1356_v62  ;;  %v1347_v5 = vld [vmem:[%s2163_s1 + $0x30] sm:$0xff] }
   0xc   :  { %60 = vperm.xlu2 %1377, %v55_v6   ;;  %47 = vperm.xlu1 %1376, %v42_v7   ;;  %v1568_v38 = vand.u32 127, %v26_v0  ;;  %v1432_v43 = vmov 0.0   ;;  %v410_v51 = vperm.slane %v1475_v4, 2  ;;  %v662_v54 = vperm.slane %v1508_v14, 3  ;;  %v1354_v4 = vld [vmem:[%s2163_s1 + $0x68] sm:$0xff] }
   0xd   :  { %v275_v58 = vperm.slane %v1489_v9, 1  ;;  %v475_v14 = vperm.slane %v1489_v9, 2 }
   0xe   :  { %40 = vperm.xlu0 %1375, %v29_v8   ;;  %v1573_v40 = vadd.s32 128, %v1568_v38  ;;  %1358 = vmatpush.bf16.msra.mxu2 %v1347_v5 }
   0xf   :  { %1022 = vmatpush.bf16.msra.mxu0 %v1347_v5 }
  0x14   :  { %1380 = vset.pattern.permute.xlu2 %v1465_v2  ;;  %1378 = vset.pattern.permute.xlu1 %v1465_v2 }
  0x16   :  { %118 = vperm.xlu0 %1375, %v107_v10  }
  0x1c   :  { %66 = vperm.xlu2 %1380, %v55_v6   ;;  %53 = vperm.xlu1 %1378, %v42_v7   ;;  %v1355_v6 = vld [vmem:[%s2163_s1 + $0x70] sm:$0xff]  ;;  %v1346_v7 = vld [vmem:[%s2163_s1 + $0x28] sm:$0xff] }
  0x1d   :  { %1366 = vmatpush.bf16.msra.mxu3 %v1355_v6  ;;  %1071 = vmatpush.bf16.msra.mxu1 %v1355_v6 }
  0x1e   :  { %460 = vperm.xlu0 %1375, %v449_v12   ;;  %1359 = vmatpush.bf16.msra.mxu2 %v1346_v7 }
  0x1f   :  { %1023 = vmatpush.bf16.msra.mxu0 %v1346_v7 }
  0x21   :  { %1367 = vmatpush.bf16.msra.mxu3 %v1354_v4  ;;  %1072 = vmatpush.bf16.msra.mxu1 %v1354_v4 }
  0x24   :  { %79 = vperm.xlu2 %1380, %v68_v15   ;;  %1379 = vset.pattern.permute.xlu1 %v1460_v1 }
  0x26   :  { %473 = vperm.xlu0 %1375, %v462_v16  }
  0x2c   :  { %1382 = vset.pattern.permute.xlu2 %v1460_v1  ;;  %73 = vperm.xlu1 %1379, %v68_v15   ;;  %v1344_v15 = vld [vmem:[%s2163_s1 + $0x18] sm:$0xff] }
  0x2e   :  { %234 = vperm.xlu0 %1375, %v223_v17  }
  0x34   :  { %99 = vperm.xlu2 %1382, %v94_v18   ;;  %1381 = vset.pattern.permute.xlu1 %v1465_v2 }
  0x36   :  { %1395 = vset.pattern.permute.xlu0 %v1460_v1 }
  0x3c   :  { %112 = vperm.xlu2 %1382, %v107_v10   ;;  %92 = vperm.xlu1 %1381, %v81_v19   ;;  %v1353_v10 = vld [vmem:[%s2163_s1 + $0x60] sm:$0xff] }
  0x3d   :  { %1368 = vmatpush.bf16.msra.mxu3 %v1353_v10  ;;  %1073 = vmatpush.bf16.msra.mxu1 %v1353_v10 }
  0x3e   :  { %34 = vperm.xlu0 %1395, %v29_v8   ;;  %v1345_v8 = vld [vmem:[%s2163_s1 + $0x20] sm:$0xff] }
  0x3f   :  { %1360 = vmatpush.bf16.msra.mxu2 %v1345_v8  ;;  %1024 = vmatpush.bf16.msra.mxu0 %v1345_v8 }
  0x43   :  { %1361 = vmatpush.bf16.msra.mxu2 %v1344_v15  ;;  %1025 = vmatpush.bf16.msra.mxu0 %v1344_v15 }
  0x44   :  { %1384 = vset.pattern.permute.xlu2 %v1465_v2  ;;  %105 = vperm.xlu1 %1381, %v94_v18   ;;  %v1351_v18 = vld [vmem:[%s2163_s1 + $0x50] sm:$0xff] }
  0x46   :  { %86 = vperm.xlu0 %1395, %v81_v19  }
  0x4c   :  { %131 = vperm.xlu2 %1384, %v120_v21   ;;  %1383 = vset.pattern.permute.xlu1 %v1460_v1 }
  0x4e   :  { %215 = vperm.xlu0 %1395, %v210_v22  }
  0x54   :  { %125 = vperm.xlu1 %1383, %v120_v21   ;;  %208 = vperm.xlu2 %1384, %v197_v23  }
  0x56   :  { %602 = vperm.xlu0 %1395, %v597_v24  }
  0x5c   :  { %1386 = vset.pattern.permute.xlu2 %v1460_v1  ;;  %202 = vperm.xlu1 %1383, %v197_v23  }
  0x5e   :  { %615 = vperm.xlu0 %1395, %v610_v25  }
  0x64   :  { %254 = vperm.xlu2 %1386, %v249_v26   ;;  %1385 = vset.pattern.permute.xlu1 %v1465_v2 }
  0x66   :  { %680 = vperm.xlu0 %1395, %v675_v27   ;;  %v1562_v36 = vpop.permute.xlu2 %60 }
  0x6c   :  { %454 = vperm.xlu2 %1386, %v449_v12   ;;  %221 = vperm.xlu1 %1385, %v210_v22  }
  0x6e   :  { %441 = vperm.xlu0 %1395, %v436_v28  }
  0x74   :  { %1388 = vset.pattern.permute.xlu2 %v1465_v2  ;;  %260 = vperm.xlu1 %1385, %v249_v26   ;;  %v423_v26 = vperm.slane %v1470_v3, 2 }
  0x76   :  { %1402 = vset.pattern.permute.xlu0 %v1465_v2  ;;  %v67_v39 = vpop.permute.xlu2 %66 }
  0x77   :  { %vm143_vm0 = vcmp.eq.s32.totalorder %v1568_v38, %v67_v39  ;;  %vm144_vm1 = vcmp.eq.s32.totalorder %v1573_v40, %v67_v39 }
  0x78   :  { %v175_v44 = vsel %vm143_vm0, 1.0, %v1432_v43  ;;  %v176_v45 = vsel %vm144_vm1, 1.0, %v1432_v43 }
  0x7c   :  { %408 = vperm.xlu2 %1388, %v397_v29   ;;  %1387 = vset.pattern.permute.xlu1 %v1460_v1 }
  0x7e   :  { %299 = vperm.xlu0 %1402, %v288_v30   ;;  %v1579_v42 = vpop.permute.xlu1 %47  ;;  %v1590_v50 = vpop.permute.xlu2 %79 }
  0x80   :  { %v1553_v31 = vpop.permute.xlu0 %40 }
  0x84   :  { %660 = vperm.xlu2 %1388, %v649_v32   ;;  %402 = vperm.xlu1 %1387, %v397_v29   ;;  %v1342_v29 = vld [vmem:[%s2163_s1 + $0x8] sm:$0xff] }
  0x88   :  { %v1556_v33 = vpop.permute.xlu0 %118 }
  0x8c   :  { %1390 = vset.pattern.permute.xlu2 %v1460_v1  ;;  %654 = vperm.xlu1 %1387, %v649_v32   ;;  %v1350_v32 = vld [vmem:[%s2163_s1 + $0x48] sm:$0xff] }
  0x8e   :  { %v1593_v52 = vpop.permute.xlu1 %53  ;;  %v1596_v53 = vpop.permute.xlu2 %99 }
  0x8f   :  { %vm139_vm4 = vcmp.eq.s32.totalorder %v1568_v38, %v1593_v52  ;;  %vm140_vm5 = vcmp.eq.s32.totalorder %v1573_v40, %v1593_v52 }
  0x90   :  { %v1559_v34 = vpop.permute.xlu0 %460  ;;  %v171_v21 = vsel %vm139_vm4, 1.0, %v1432_v43  ;;  %v172_v23 = vsel %vm140_vm5, 1.0, %v1432_v43 }
  0x91   :  { %vm519_vm12 = vcmp.eq.s32.totalorder %v1568_v38, %v1559_v34  ;;  %vm520_vm13 = vcmp.eq.s32.totalorder %v1573_v40, %v1559_v34 }
  0x92   :  { %v551_v6 = vsel %vm519_vm12, 1.0, %v1432_v43  ;;  %v552_v7 = vsel %vm520_vm13, 1.0, %v1432_v43  ;;  %vm135_vm12 = vcmp.eq.s32.totalorder %v1568_v38, %v1553_v31  ;;  %vm136_vm13 = vcmp.eq.s32.totalorder %v1573_v40, %v1553_v31 }
  0x94   :  { %267 = vperm.xlu2 %1390, %v262_v35   ;;  %1389 = vset.pattern.permute.xlu1 %v1465_v2 }
  0x96   :  { %v1601_v56 = vpop.permute.xlu2 %112 }
  0x98   :  { %v1565_v37 = vpop.permute.xlu0 %473 }
  0x9c   :  { %467 = vperm.xlu2 %1390, %v462_v16   ;;  %608 = vperm.xlu1 %1389, %v597_v24   ;;  %v1352_v16 = vld [vmem:[%s2163_s1 + $0x58] sm:$0xff] }
  0x9d   :  { %1369 = vmatpush.bf16.msra.mxu3 %v1352_v16  ;;  %1074 = vmatpush.bf16.msra.mxu1 %v1352_v16 }
  0x9e   :  { %v1599_v55 = vpop.permute.xlu1 %73 }
  0xa0   :  { %v235_v41 = vpop.permute.xlu0 %234 }
  0xa1   :  { %vm311_vm2 = vcmp.eq.s32.totalorder %v1568_v38, %v235_v41  ;;  %vm312_vm3 = vcmp.eq.s32.totalorder %v1573_v40, %v235_v41  ;;  %1370 = vmatpush.bf16.msra.mxu3 %v1351_v18  ;;  %1075 = vmatpush.bf16.msra.mxu1 %v1351_v18  ;;  %v1341_v41 = vld [vmem:[%s2163_s1] sm:$0xff] }
  0xa2   :  { %v343_v46 = vsel %vm311_vm2, 1.0, %v1432_v43  ;;  %v344_v47 = vsel %vm312_vm3, 1.0, %v1432_v43 }
  0xa3   :  { %v1585_v48 = vadd.f32 %v343_v46, %v175_v44  ;;  %v1587_v49 = vadd.f32 %v344_v47, %v176_v45  ;;  %v1349_v44 = vld [vmem:[%s2163_s1 + $0x40] sm:$0xff] }
  0xa4   :  { %1392 = vset.pattern.permute.xlu2 %v1465_v2  ;;  %273 = vperm.xlu1 %1389, %v262_v35  }
  0xa5   :  { %1371 = vmatpush.bf16.msra.mxu3 %v1350_v32  ;;  %1076 = vmatpush.bf16.msra.mxu1 %v1350_v32 }
  0xa6   :  { %v1607_v59 = vpop.permute.xlu2 %131 }
  0xa9   :  { %1372 = vmatpush.bf16.msra.mxu3 %v1349_v44  ;;  %1077 = vmatpush.bf16.msra.mxu1 %v1349_v44 }
  0xac   :  { %421 = vperm.xlu2 %1392, %v410_v51   ;;  %1391 = vset.pattern.permute.xlu1 %v1460_v1 }
  0xae   :  { %v1603_v57 = vpop.permute.xlu1 %92  ;;  %v1618_v63 = vpop.permute.xlu2 %208 }
  0xaf   :  { %vm151_vm10 = vcmp.eq.s32.totalorder %v1568_v38, %v1603_v57  ;;  %vm152_vm11 = vcmp.eq.s32.totalorder %v1573_v40, %v1603_v57 }
  0xb0   :  { %v1692_v45 = vpop.permute.xlu0 %34  ;;  %v183_v62 = vsel %vm151_vm10, 1.0, %v1432_v43  ;;  %v184_v5 = vsel %vm152_vm11, 1.0, %v1432_v43 }
  0xb4   :  { %673 = vperm.xlu2 %1392, %v662_v54   ;;  %415 = vperm.xlu1 %1391, %v410_v51   ;;  %v623_v51 = vperm.slane %v1470_v3, 3 }
  0xb6   :  { %v1609_v60 = vpop.permute.xlu1 %105 }
  0xb8   :  { %v87_v61 = vpop.permute.xlu0 %86 }
  0xb9   :  { %vm149_vm14 = vcmp.eq.s32.totalorder %v1568_v38, %v87_v61  ;;  %vm150_vm15 = vcmp.eq.s32.totalorder %v1573_v40, %v87_v61 }
  0xba   :  { %v181_v8 = vsel %vm149_vm14, 1.0, %v1432_v43  ;;  %v182_v10 = vsel %vm150_vm15, 1.0, %v1432_v43  ;;  %vm303_vm14 = vcmp.eq.s32.totalorder %v1568_v38, %v1618_v63  ;;  %vm304_vm15 = vcmp.eq.s32.totalorder %v1573_v40, %v1618_v63 }
  0xbc   :  { %1394 = vset.pattern.permute.xlu2 %v1460_v1  ;;  %667 = vperm.xlu1 %1391, %v662_v54  }
  0xbe   :  { %v1645_v11 = vpop.permute.xlu2 %254 }
  0xbf   :  { %vm317_vm0 = vcmp.eq.s32.totalorder %v1568_v38, %v1645_v11  ;;  %vm318_vm1 = vcmp.eq.s32.totalorder %v1573_v40, %v1645_v11 }
  0xc0   :  { %v350_v15 = vsel %vm318_vm1, 1.0, %v1432_v43 }
  0xc4   :  { %280 = vperm.xlu2 %1394, %v275_v58   ;;  %1393 = vset.pattern.permute.xlu1 %v1465_v2 }
  0xc6   :  { %v1620_v0 = vpop.permute.xlu1 %125  ;;  %v1668_v22 = vpop.permute.xlu2 %454 }
  0xc7   :  { %vm517_vm4 = vcmp.eq.s32.totalorder %v1568_v38, %v1668_v22  ;;  %vm518_vm5 = vcmp.eq.s32.totalorder %v1573_v40, %v1668_v22  ;;  %v1743_v22 = vpop.permute.xlu0 %215 }
  0xcc   :  { %228 = vperm.xlu2 %1394, %v223_v17   ;;  %621 = vperm.xlu1 %1393, %v610_v25   ;;  %v1343_v17 = vld [vmem:[%s2163_s1 + $0x10] sm:$0xff] }
  0xcd   :  { %1362 = vmatpush.bf16.msra.mxu2 %v1343_v17  ;;  %1026 = vmatpush.bf16.msra.mxu0 %v1343_v17 }
  0xce   :  { %v1647_v12 = vpop.permute.xlu1 %202 }
  0xcf   :  { %vm301_vm10 = vcmp.eq.s32.totalorder %v1568_v38, %v1647_v12  ;;  %vm302_vm11 = vcmp.eq.s32.totalorder %v1573_v40, %v1647_v12 }
  0xd1   :  { %1363 = vmatpush.bf16.msra.mxu2 %v1342_v29  ;;  %1027 = vmatpush.bf16.msra.mxu0 %v1342_v29 }
  0xd4   :  { %1397 = vset.pattern.permute.xlu2 %v1465_v2  ;;  %286 = vperm.xlu1 %1393, %v275_v58  }
  0xd5   :  { %1364 = vmatpush.bf16.msra.mxu2 %v1341_v41  ;;  %1028 = vmatpush.bf16.msra.mxu0 %v1341_v41 }
  0xd6   :  { %v1694_v46 = vpop.permute.xlu2 %408 }
  0xdc   :  { %486 = vperm.xlu2 %1397, %v475_v14   ;;  %1396 = vset.pattern.permute.xlu1 %v1460_v1 }
  0xde   :  { %v222_v19 = vpop.permute.xlu1 %221  ;;  %v661_v52 = vpop.permute.xlu2 %660 }
  0xdf   :  { %vm307_vm6 = vcmp.eq.s32.totalorder %v1568_v38, %v222_v19  ;;  %vm308_vm7 = vcmp.eq.s32.totalorder %v1573_v40, %v222_v19  ;;  %vm719_vm2 = vcmp.eq.s32.totalorder %v1568_v38, %v661_v52  ;;  %vm720_vm3 = vcmp.eq.s32.totalorder %v1573_v40, %v661_v52 }
  0xe0   :  { %v339_v24 = vsel %vm307_vm6, 1.0, %v1432_v43  ;;  %v340_v25 = vsel %vm308_vm7, 1.0, %v1432_v43  ;;  %v751_v17 = vsel %vm719_vm2, 1.0, %v1432_v43  ;;  %v752_v18 = vsel %vm720_vm3, 1.0, %v1432_v43 }
  0xe1   :  { %v1682_v35 = vadd.f32 %v339_v24, %v171_v21  ;;  %v1684_v39 = vadd.f32 %v340_v25, %v172_v23  ;;  %v382_v21 = vadd.f32 %v350_v15, %v182_v10  ;;  %v549_v24 = vsel %vm517_vm4, 1.0, %v1432_v43 }
  0xe2   :  { %v550_v25 = vsel %vm518_vm5, 1.0, %v1432_v43  ;;  %vm133_vm6 = vcmp.eq.s32.totalorder %v1568_v38, %v1692_v45  ;;  %vm503_vm4 = vcmp.eq.s32.totalorder %v1568_v38, %v1694_v46  ;;  %vm504_vm5 = vcmp.eq.s32.totalorder %v1573_v40, %v1694_v46 }
  0xe3   :  { %v582_v44 = vadd.f32 %v550_v25, %v382_v21  ;;  %v336_v21 = vsel %vm304_vm15, 1.0, %v1432_v43 }
  0xe4   :  { %434 = vperm.xlu2 %1397, %v423_v26   ;;  %480 = vperm.xlu1 %1396, %v475_v14   ;;  %v349_v14 = vsel %vm317_vm0, 1.0, %v1432_v43 }
  0xe5   :  { %v381_v19 = vadd.f32 %v349_v14, %v181_v8 }
  0xe6   :  { %v261_v47 = vpop.permute.xlu1 %260 }
  0xe7   :  { %vm319_vm8 = vcmp.eq.s32.totalorder %v1568_v38, %v261_v47  ;;  %vm320_vm9 = vcmp.eq.s32.totalorder %v1573_v40, %v261_v47  ;;  %v581_v41 = vadd.f32 %v549_v24, %v381_v19  ;;  %v168_v19 = vsel %vm136_vm13, 1.0, %v1432_v43 }
  0xe8   :  { %v351_v54 = vsel %vm319_vm8, 1.0, %v1432_v43  ;;  %v352_v58 = vsel %vm320_vm9, 1.0, %v1432_v43  ;;  %vm134_vm9 = vcmp.eq.s32.totalorder %v1573_v40, %v1692_v45  ;;  %v368_v31 = vadd.f32 %v336_v21, %v168_v19 }
  0xe9   :  { %v383_v34 = vadd.f32 %v351_v54, %v183_v62  ;;  %v384_v57 = vadd.f32 %v352_v58, %v184_v5  ;;  %v165_v58 = vsel %vm133_vm6, 1.0, %v1432_v43  ;;  %v166_v61 = vsel %vm134_vm9, 1.0, %v1432_v43 }
  0xea   :  { %v333_v62 = vsel %vm301_vm10, 1.0, %v1432_v43  ;;  %v334_v5 = vsel %vm302_vm11, 1.0, %v1432_v43  ;;  %vm524_vm9 = vcmp.eq.s32.totalorder %v1573_v40, %v1565_v37  ;;  %vm155_vm10 = vcmp.eq.s32.totalorder %v1568_v38, %v1609_v60 }
  0xeb   :  { %v583_v11 = vadd.f32 %v551_v6, %v383_v34  ;;  %v584_v16 = vadd.f32 %v552_v7, %v384_v57  ;;  %v603_v34 = vpop.permute.xlu0 %602  ;;  %v366_v10 = vadd.f32 %v334_v5, %v166_v61  ;;  %vm156_vm11 = vcmp.eq.s32.totalorder %v1573_v40, %v1609_v60 }
  0xec   :  { %1399 = vset.pattern.permute.xlu2 %v1460_v1  ;;  %428 = vperm.xlu1 %1396, %v423_v26   ;;  %vm701_vm2 = vcmp.eq.s32.totalorder %v1568_v38, %v603_v34  ;;  %vm702_vm3 = vcmp.eq.s32.totalorder %v1573_v40, %v603_v34 }
  0xed   :  { %v783_v26 = vadd.f32 %v751_v17, %v583_v11  ;;  %v784_v29 = vadd.f32 %v752_v18, %v584_v16  ;;  %v167_v11 = vsel %vm135_vm12, 1.0, %v1432_v43  ;;  %v236_v16 = vperm.slane %v1503_v13, 1 }
  0xee   :  { %v1735_v23 = vpop.permute.xlu2 %267  ;;  %v733_v24 = vsel %vm701_vm2, 1.0, %v1432_v43  ;;  %v734_v46 = vsel %vm702_vm3, 1.0, %v1432_v43  ;;  %vm153_vm2 = vcmp.eq.s32.totalorder %v1568_v38, %v1596_v53  ;;  %vm154_vm3 = vcmp.eq.s32.totalorder %v1573_v40, %v1596_v53 }
  0xef   :  { %v806_v52 = vpack.c.bf16 %v784_v29, %v783_v26  ;;  %v535_v26 = vsel %vm503_vm4, 1.0, %v1432_v43  ;;  %v536_v29 = vsel %vm504_vm5, 1.0, %v1432_v43 }
  0xf1   :  { %v879_v7 = vunpack.c.l.b16 %v806_v52  ;;  %v880_v45 = vunpack.c.h.b16 %v806_v52 }
  0xf4   :  { %628 = vperm.xlu2 %1399, %v623_v51   ;;  %1398 = vset.pattern.permute.xlu1 %v1465_v2 }
  0xf6   :  { %v403_v4 = vpop.permute.xlu1 %402  ;;  %v1783_v57 = vpop.permute.xlu2 %467 }
  0xf7   :  { %vm501_vm0 = vcmp.eq.s32.totalorder %v1568_v38, %v403_v4  ;;  %vm502_vm1 = vcmp.eq.s32.totalorder %v1573_v40, %v403_v4  ;;  %v335_v4 = vsel %vm303_vm14, 1.0, %v1432_v43  ;;  %vm521_vm4 = vcmp.eq.s32.totalorder %v1568_v38, %v1783_v57 }
  0xf8   :  { %v533_v12 = vsel %vm501_vm0, 1.0, %v1432_v43  ;;  %v534_v3 = vsel %vm502_vm1, 1.0, %v1432_v43  ;;  %v367_v25 = vadd.f32 %v335_v4, %v167_v11  ;;  %vm321_vm0 = vcmp.eq.s32.totalorder %v1568_v38, %v1735_v23 }
  0xf9   :  { %v566_v18 = vadd.f32 %v534_v3, %v366_v10  ;;  %v556_v3 = vsel %vm524_vm9, 1.0, %v1432_v43  ;;  %vm322_vm1 = vcmp.eq.s32.totalorder %v1573_v40, %v1735_v23  ;;  %vm522_vm5 = vcmp.eq.s32.totalorder %v1573_v40, %v1783_v57 }
  0xfa   :  { %v186_v23 = vsel %vm154_vm3, 1.0, %v1432_v43  ;;  %vm306_vm9 = vcmp.eq.s32.totalorder %v1573_v40, %v1743_v22 }
  0xfb   :  { %v766_v63 = vadd.f32 %v734_v46, %v566_v18 }
  0xfc   :  { %293 = vperm.xlu2 %1399, %v288_v30   ;;  %686 = vperm.xlu1 %1398, %v675_v27  }
  0xfe   :  { %v655_v32 = vpop.permute.xlu1 %654 }
  0xff   :  { %vm717_vm7 = vcmp.eq.s32.totalorder %v1568_v38, %v655_v32  ;;  %vm718_vm8 = vcmp.eq.s32.totalorder %v1573_v40, %v655_v32 }
 0x100   :  { %v749_v9 = vsel %vm717_vm7, 1.0, %v1432_v43  ;;  %v750_v27 = vsel %vm718_vm8, 1.0, %v1432_v43  ;;  %vm523_vm8 = vcmp.eq.s32.totalorder %v1568_v38, %v1565_v37 }
 0x101   :  { %v781_v30 = vadd.f32 %v749_v9, %v581_v41  ;;  %v782_v47 = vadd.f32 %v750_v27, %v582_v44  ;;  %v636_v44 = vperm.slane %v1503_v13, 3  ;;  %v567_v27 = vadd.f32 %v535_v26, %v367_v25 }
 0x102   :  { %v688_v26 = vperm.slane %v1527_v20, 3 }
 0x103   :  { %v805_v54 = vpack.c.bf16 %v782_v47, %v781_v30  ;;  %v568_v30 = vadd.f32 %v536_v29, %v368_v31  ;;  %647 = vperm.xlu0 %1402, %v636_v44   ;;  %v553_v31 = vsel %vm521_vm4, 1.0, %v1432_v43 }
 0x104   :  { %1401 = vset.pattern.permute.xlu2 %v1465_v2  ;;  %634 = vperm.xlu1 %1398, %v623_v51   ;;  %v365_v51 = vadd.f32 %v333_v62, %v165_v58 }
 0x105   :  { %v877_v6 = vunpack.c.l.b16 %v805_v54  ;;  %v878_v8 = vunpack.c.h.b16 %v805_v54  ;;  %v488_v54 = vperm.slane %v1527_v20, 2  ;;  %v185_v20 = vsel %vm153_vm2, 1.0, %v1432_v43 }
 0x106   :  { %v565_v17 = vadd.f32 %v533_v12, %v365_v51  ;;  %v1823_v41 = vpop.permute.xlu2 %421  ;;  %v555_v12 = vsel %vm523_vm8, 1.0, %v1432_v43 }
 0x107   :  { %v901_v14 = vpack.c.b16 %v879_v7, %v877_v6  ;;  %v902_v15 = vpack.c.b16 %v880_v45, %v878_v8 }
 0x108   :  { %v765_v32 = vadd.f32 %v733_v24, %v565_v17 }
 0x109   :  { %1049 = vmatmul.bf16.vlgmr.msra.gmra.mxu2 %v901_v14  ;;  %1098 = vmatmul.bf16.vlgmr.msra.gmra.mxu3 %v902_v15  ;;  %v187_v14 = vsel %vm155_vm10, 1.0, %v1432_v43  ;;  %v188_v15 = vsel %vm156_vm11, 1.0, %v1432_v43  ;;  %vm137_vm10 = vcmp.eq.s32.totalorder %v1568_v38, %v1579_v42  ;;  %vm138_vm11 = vcmp.eq.s32.totalorder %v1573_v40, %v1579_v42 }
 0x10a   :  { %v797_v62 = vpack.c.bf16 %v766_v63, %v765_v32  ;;  %v554_v32 = vsel %vm522_vm5, 1.0, %v1432_v43 }
 0x10c   :  { %247 = vperm.xlu2 %1401, %v236_v16   ;;  %1400 = vset.pattern.permute.xlu1 %v1460_v1  ;;  %v861_v6 = vunpack.c.l.b16 %v797_v62  ;;  %v862_v8 = vunpack.c.h.b16 %v797_v62 }
 0x10e   :  { %v609_v9 = vpop.permute.xlu1 %608  ;;  %v674_v34 = vpop.permute.xlu2 %673 }
 0x10f   :  { %vm703_vm6 = vcmp.eq.s32.totalorder %v1568_v38, %v609_v9  ;;  %vm704_vm7 = vcmp.eq.s32.totalorder %v1573_v40, %v609_v9  ;;  %vm723_vm12 = vcmp.eq.s32.totalorder %v1568_v38, %v674_v34  ;;  %vm724_vm13 = vcmp.eq.s32.totalorder %v1573_v40, %v674_v34 }
 0x110   :  { %v735_v47 = vsel %vm703_vm6, 1.0, %v1432_v43  ;;  %v736_v52 = vsel %vm704_vm7, 1.0, %v1432_v43  ;;  %v755_v18 = vsel %vm723_vm12, 1.0, %v1432_v43  ;;  %v756_v19 = vsel %vm724_vm13, 1.0, %v1432_v43 }
 0x111   :  { %v767_v58 = vadd.f32 %v735_v47, %v567_v27  ;;  %v768_v61 = vadd.f32 %v736_v52, %v568_v30  ;;  %vm305_vm6 = vcmp.eq.s32.totalorder %v1568_v38, %v1743_v22  ;;  %v338_v52 = vsel %vm306_vm9, 1.0, %v1432_v43 }
 0x112   :  { %v337_v47 = vsel %vm305_vm6, 1.0, %v1432_v43  ;;  %vm157_vm6 = vcmp.eq.s32.totalorder %v1568_v38, %v1601_v56 }
 0x113   :  { %v798_v5 = vpack.c.bf16 %v768_v61, %v767_v58  ;;  %v170_v58 = vsel %vm138_vm11, 1.0, %v1432_v43  ;;  %vm142_vm11 = vcmp.eq.s32.totalorder %v1573_v40, %v1562_v36 }
 0x114   :  { %499 = vperm.xlu2 %1401, %v488_v54   ;;  %241 = vperm.xlu1 %1400, %v236_v16  }
 0x115   :  { %v863_v7 = vunpack.c.l.b16 %v798_v5  ;;  %v864_v45 = vunpack.c.h.b16 %v798_v5 }
 0x116   :  { %v274_v37 = vpop.permute.xlu1 %273 }
 0x117   :  { %vm323_vm14 = vcmp.eq.s32.totalorder %v1568_v38, %v274_v37  ;;  %vm324_vm15 = vcmp.eq.s32.totalorder %v1573_v40, %v274_v37  ;;  %v893_v51 = vpack.c.b16 %v863_v7, %v861_v6  ;;  %v894_v10 = vpack.c.b16 %v864_v45, %v862_v8  ;;  %v616_v7 = vpop.permute.xlu0 %615 }
 0x118   :  { %v355_v11 = vsel %vm323_vm14, 1.0, %v1432_v43  ;;  %v356_v16 = vsel %vm324_vm15, 1.0, %v1432_v43  ;;  %v370_v6 = vadd.f32 %v338_v52, %v170_v58  ;;  %vm705_vm14 = vcmp.eq.s32.totalorder %v1568_v38, %v616_v7 }
 0x119   :  { %v387_v4 = vadd.f32 %v355_v11, %v187_v14  ;;  %v388_v17 = vadd.f32 %v356_v16, %v188_v15  ;;  %1029 = vmatmul.bf16.vlgmr.msra.gmra.mxu0 %v893_v51  ;;  %1078 = vmatmul.bf16.vlgmr.msra.gmra.mxu1 %v894_v10  ;;  %vm706_vm15 = vcmp.eq.s32.totalorder %v1573_v40, %v616_v7  ;;  %v737_v10 = vsel %vm705_vm14, 1.0, %v1432_v43 }
 0x11a   :  { %v738_v14 = vsel %vm706_vm15, 1.0, %v1432_v43 }
 0x11b   :  { %v587_v21 = vadd.f32 %v555_v12, %v387_v4  ;;  %v588_v24 = vadd.f32 %v556_v3, %v388_v17 }
 0x11c   :  { %493 = vperm.xlu1 %1400, %v488_v54   ;;  %1404 = vset.pattern.permute.xlu2 %v1460_v1  ;;  %v353_v1 = vsel %vm321_vm0, 1.0, %v1432_v43  ;;  %v169_v54 = vsel %vm137_vm10, 1.0, %v1432_v43  ;;  %vm507_vm0 = vcmp.eq.s32.totalorder %v1568_v38, %v1823_v41  ;;  %vm141_vm10 = vcmp.eq.s32.totalorder %v1568_v38, %v1562_v36 }
 0x11d   :  { %v787_v46 = vadd.f32 %v755_v18, %v587_v21  ;;  %v788_v60 = vadd.f32 %v756_v19, %v588_v24  ;;  %v385_v53 = vadd.f32 %v353_v1, %v185_v20  ;;  %v369_v34 = vadd.f32 %v337_v47, %v169_v54 }
 0x11e   :  { %v539_v15 = vsel %vm507_vm0, 1.0, %v1432_v43 }
 0x11f   :  { %v808_v25 = vpack.c.bf16 %v788_v60, %v787_v46  ;;  %v585_v9 = vadd.f32 %v553_v31, %v385_v53  ;;  %v571_v18 = vadd.f32 %v539_v15, %v1682_v35 }
 0x121   :  { %v883_v62 = vunpack.c.l.b16 %v808_v25  ;;  %v884_v42 = vunpack.c.h.b16 %v808_v25 }
 0x124   :  { %1403 = vset.pattern.permute.xlu1 %v1465_v2  ;;  %693 = vperm.xlu2 %1404, %v688_v26   ;;  %v354_v2 = vsel %vm322_vm1, 1.0, %v1432_v43  ;;  %vm508_vm1 = vcmp.eq.s32.totalorder %v1573_v40, %v1823_v41 }
 0x125   :  { %v386_v57 = vadd.f32 %v354_v2, %v186_v23  ;;  %v540_v11 = vsel %vm508_vm1, 1.0, %v1432_v43 }
 0x126   :  { %v416_v29 = vpop.permute.xlu1 %415  ;;  %v572_v19 = vadd.f32 %v540_v11, %v1684_v39 }
 0x127   :  { %v586_v27 = vadd.f32 %v554_v32, %v386_v57  ;;  %vm505_vm12 = vcmp.eq.s32.totalorder %v1568_v38, %v416_v29  ;;  %vm506_vm13 = vcmp.eq.s32.totalorder %v1573_v40, %v416_v29 }
 0x128   :  { %v537_v8 = vsel %vm505_vm12, 1.0, %v1432_v43  ;;  %v538_v45 = vsel %vm506_vm13, 1.0, %v1432_v43  ;;  %vm159_vm12 = vcmp.eq.s32.totalorder %v1568_v38, %v1556_v33  ;;  %vm160_vm13 = vcmp.eq.s32.totalorder %v1573_v40, %v1556_v33 }
 0x129   :  { %v569_v37 = vadd.f32 %v537_v8, %v369_v34  ;;  %v570_v51 = vadd.f32 %v538_v45, %v370_v6  ;;  %v173_v33 = vsel %vm141_vm10, 1.0, %v1432_v43 }
 0x12b   :  { %v769_v16 = vadd.f32 %v737_v10, %v569_v37  ;;  %v770_v4 = vadd.f32 %v738_v14, %v570_v51  ;;  %v174_v51 = vsel %vm142_vm11, 1.0, %v1432_v43 }
 0x12c   :  { %447 = vperm.xlu1 %1403, %v436_v28   ;;  %641 = vperm.xlu2 %1404, %v636_v44  }
 0x12d   :  { %v799_v60 = vpack.c.bf16 %v770_v4, %v769_v16 }
 0x12e   :  { %v668_v63 = vpop.permute.xlu1 %667 }
 0x12f   :  { %vm721_vm7 = vcmp.eq.s32.totalorder %v1568_v38, %v668_v63  ;;  %vm722_vm8 = vcmp.eq.s32.totalorder %v1573_v40, %v668_v63  ;;  %v865_v29 = vunpack.c.l.b16 %v799_v60  ;;  %v866_v2 = vunpack.c.h.b16 %v799_v60 }
 0x130   :  { %v753_v28 = vsel %vm721_vm7, 1.0, %v1432_v43  ;;  %v754_v13 = vsel %vm722_vm8, 1.0, %v1432_v43  ;;  %vm158_vm7 = vcmp.eq.s32.totalorder %v1573_v40, %v1601_v56  ;;  %v189_v56 = vsel %vm157_vm6, 1.0, %v1432_v43 }
 0x131   :  { %v785_v44 = vadd.f32 %v753_v28, %v585_v9  ;;  %v786_v30 = vadd.f32 %v754_v13, %v586_v27  ;;  %v190_v27 = vsel %vm158_vm7, 1.0, %v1432_v43  ;;  %v681_v28 = vpop.permute.xlu0 %680 }
 0x132   :  { %vm725_vm0 = vcmp.eq.s32.totalorder %v1568_v38, %v681_v28  ;;  %vm726_vm1 = vcmp.eq.s32.totalorder %v1573_v40, %v681_v28 }
 0x133   :  { %v807_v22 = vpack.c.bf16 %v786_v30, %v785_v44  ;;  %v757_v34 = vsel %vm725_vm0, 1.0, %v1432_v43  ;;  %v758_v6 = vsel %vm726_vm1, 1.0, %v1432_v43  ;;  %vm147_vm0 = vcmp.eq.s32.totalorder %v1568_v38, %v1590_v50 }
 0x134   :  { %699 = vperm.xlu1 %1403, %v688_v26   ;;  %v281_v26 = vpop.permute.xlu2 %280  ;;  %vm148_vm1 = vcmp.eq.s32.totalorder %v1573_v40, %v1590_v50 }
 0x135   :  { %v881_v61 = vunpack.c.l.b16 %v807_v22  ;;  %v882_v5 = vunpack.c.h.b16 %v807_v22  ;;  %vm325_vm4 = vcmp.eq.s32.totalorder %v1568_v38, %v281_v26  ;;  %vm326_vm5 = vcmp.eq.s32.totalorder %v1573_v40, %v281_v26 }
 0x136   :  { %v357_v63 = vsel %vm325_vm4, 1.0, %v1432_v43  ;;  %v358_v9 = vsel %vm326_vm5, 1.0, %v1432_v43 }
 0x137   :  { %v903_v12 = vpack.c.b16 %v883_v62, %v881_v61  ;;  %v904_v3 = vpack.c.b16 %v884_v42, %v882_v5  ;;  %v389_v30 = vadd.f32 %v357_v63, %v189_v56  ;;  %v390_v47 = vadd.f32 %v358_v9, %v190_v27 }
 0x138   :  { %v191_v5 = vsel %vm159_vm12, 1.0, %v1432_v43  ;;  %v192_v42 = vsel %vm160_vm13, 1.0, %v1432_v43 }
 0x139   :  { %1054 = vmatmul.bf16.gmra.mxu2 %v903_v12  ;;  %1103 = vmatmul.bf16.gmra.mxu3 %v904_v3 }
 0x13c   :  { %v229_v39 = vpop.permute.xlu2 %228 }
 0x13e   :  { %v622_v17 = vpop.permute.xlu1 %621 }
 0x13f   :  { %vm707_vm2 = vcmp.eq.s32.totalorder %v1568_v38, %v622_v17  ;;  %vm708_vm3 = vcmp.eq.s32.totalorder %v1573_v40, %v622_v17 }
 0x140   :  { %v739_v41 = vsel %vm707_vm2, 1.0, %v1432_v43  ;;  %v740_v21 = vsel %vm708_vm3, 1.0, %v1432_v43  ;;  %vm309_vm2 = vcmp.eq.s32.totalorder %v1568_v38, %v229_v39  ;;  %vm310_vm3 = vcmp.eq.s32.totalorder %v1573_v40, %v229_v39 }
 0x141   :  { %v771_v24 = vadd.f32 %v739_v41, %v571_v18  ;;  %v772_v46 = vadd.f32 %v740_v21, %v572_v19  ;;  %v341_v7 = vsel %vm309_vm2, 1.0, %v1432_v43  ;;  %v342_v8 = vsel %vm310_vm3, 1.0, %v1432_v43 }
 0x142   :  { %v373_v15 = vadd.f32 %v341_v7, %v173_v33  ;;  %v374_v11 = vadd.f32 %v342_v8, %v174_v51  ;;  %vm145_vm2 = vcmp.eq.s32.totalorder %v1568_v38, %v1599_v55  ;;  %vm146_vm3 = vcmp.eq.s32.totalorder %v1573_v40, %v1599_v55 }
 0x143   :  { %v800_v25 = vpack.c.bf16 %v772_v46, %v771_v24  ;;  %v179_v8 = vsel %vm147_vm0, 1.0, %v1432_v43  ;;  %v177_v50 = vsel %vm145_vm2, 1.0, %v1432_v43 }
 0x144   :  { %v487_v32 = vpop.permute.xlu2 %486 }
 0x145   :  { %v867_v1 = vunpack.c.l.b16 %v800_v25  ;;  %v868_v20 = vunpack.c.h.b16 %v800_v25  ;;  %vm527_vm4 = vcmp.eq.s32.totalorder %v1568_v38, %v487_v32  ;;  %vm528_vm5 = vcmp.eq.s32.totalorder %v1573_v40, %v487_v32 }
 0x146   :  { %v287_v31 = vpop.permute.xlu1 %286  ;;  %v559_v3 = vsel %vm527_vm4, 1.0, %v1432_v43  ;;  %v560_v37 = vsel %vm528_vm5, 1.0, %v1432_v43  ;;  %vm163_vm4 = vcmp.eq.s32.totalorder %v1568_v38, %v1607_v59 }
 0x147   :  { %v895_v35 = vpack.c.b16 %v867_v1, %v865_v29  ;;  %v896_v23 = vpack.c.b16 %v868_v20, %v866_v2  ;;  %vm327_vm14 = vcmp.eq.s32.totalorder %v1568_v38, %v287_v31  ;;  %vm328_vm15 = vcmp.eq.s32.totalorder %v1573_v40, %v287_v31 }
 0x148   :  { %v359_v22 = vsel %vm327_vm14, 1.0, %v1432_v43  ;;  %v360_v54 = vsel %vm328_vm15, 1.0, %v1432_v43 }
 0x149   :  { %1034 = vmatmul.bf16.gmra.mxu0 %v895_v35  ;;  %1083 = vmatmul.bf16.gmra.mxu1 %v896_v23  ;;  %v391_v45 = vadd.f32 %v359_v22, %v191_v5  ;;  %v392_v12 = vadd.f32 %v360_v54, %v192_v42 }
 0x14b   :  { %v591_v18 = vadd.f32 %v559_v3, %v391_v45  ;;  %v592_v19 = vadd.f32 %v560_v37, %v392_v12  ;;  %v180_v12 = vsel %vm148_vm1, 1.0, %v1432_v43  ;;  %v178_v3 = vsel %vm146_vm3, 1.0, %v1432_v43 }
 0x14c   :  { %v1922_v57 = vpop.permute.xlu2 %434  ;;  %v2030_v37 = vsel %vm163_vm4, 1.0, %v1432_v43  ;;  %vm164_vm1 = vcmp.eq.s32.totalorder %v1573_v40, %v1607_v59 }
 0x14d   :  { %vm512_vm13 = vcmp.eq.s32.totalorder %v1573_v40, %v1922_v57 }
 0x14e   :  { %v544_v20 = vsel %vm512_vm13, 1.0, %v1432_v43 }
 0x14f   :  { %v576_v56 = vadd.f32 %v544_v20, %v1587_v49 }
 0x154   :  { %v629_v58 = vpop.permute.xlu2 %628 }
 0x155   :  { %vm710_vm10 = vcmp.eq.s32.totalorder %v1573_v40, %v629_v58 }
 0x156   :  { %v481_v53 = vpop.permute.xlu1 %480  ;;  %v742_v29 = vsel %vm710_vm10, 1.0, %v1432_v43  ;;  %vm162_vm10 = vcmp.eq.s32.totalorder %v1573_v40, %v1620_v0 }
 0x157   :  { %vm525_vm8 = vcmp.eq.s32.totalorder %v1568_v38, %v481_v53  ;;  %vm526_vm9 = vcmp.eq.s32.totalorder %v1573_v40, %v481_v53 }
 0x158   :  { %v557_v13 = vsel %vm525_vm8, 1.0, %v1432_v43  ;;  %v558_v44 = vsel %vm526_vm9, 1.0, %v1432_v43  ;;  %vm511_vm8 = vcmp.eq.s32.totalorder %v1568_v38, %v1922_v57  ;;  %vm709_vm9 = vcmp.eq.s32.totalorder %v1568_v38, %v629_v58 }
 0x159   :  { %v589_v61 = vadd.f32 %v557_v13, %v389_v30  ;;  %v590_v62 = vadd.f32 %v558_v44, %v390_v47  ;;  %v741_v26 = vsel %vm709_vm9, 1.0, %v1432_v43  ;;  %v543_v2 = vsel %vm511_vm8, 1.0, %v1432_v43 }
 0x15a   :  { %v575_v9 = vadd.f32 %v543_v2, %v1585_v48  ;;  %vm161_vm9 = vcmp.eq.s32.totalorder %v1568_v38, %v1620_v0 }
 0x15b   :  { %v789_v10 = vadd.f32 %v757_v34, %v589_v61  ;;  %v790_v14 = vadd.f32 %v758_v6, %v590_v62  ;;  %v442_v34 = vpop.permute.xlu0 %441 }
 0x15c   :  { %v1996_v1 = vpop.permute.xlu2 %293 }
 0x15d   :  { %v809_v21 = vpack.c.bf16 %v790_v14, %v789_v10  ;;  %vm330_vm8 = vcmp.eq.s32.totalorder %v1573_v40, %v1996_v1 }
 0x15e   :  { %v429_v52 = vpop.permute.xlu1 %428  ;;  %v362_v0 = vsel %vm330_vm8, 1.0, %v1432_v43 }
 0x15f   :  { %vm509_vm6 = vcmp.eq.s32.totalorder %v1568_v38, %v429_v52  ;;  %vm510_vm7 = vcmp.eq.s32.totalorder %v1573_v40, %v429_v52  ;;  %v885_v23 = vunpack.c.l.b16 %v809_v21  ;;  %v886_v39 = vunpack.c.h.b16 %v809_v21 }
 0x160   :  { %v541_v16 = vsel %vm509_vm6, 1.0, %v1432_v43  ;;  %v542_v4 = vsel %vm510_vm7, 1.0, %v1432_v43  ;;  %vm329_vm7 = vcmp.eq.s32.totalorder %v1568_v38, %v1996_v1 }
 0x161   :  { %v573_v24 = vadd.f32 %v541_v16, %v373_v15  ;;  %v574_v46 = vadd.f32 %v542_v4, %v374_v11  ;;  %v361_v14 = vsel %vm329_vm7, 1.0, %v1432_v43  ;;  %v193_v16 = vsel %vm161_vm9, 1.0, %v1432_v43 }
 0x162   :  { %v194_v4 = vsel %vm162_vm10, 1.0, %v1432_v43 }
 0x163   :  { %v773_v31 = vadd.f32 %v741_v26, %v573_v24  ;;  %v774_v32 = vadd.f32 %v742_v29, %v574_v46  ;;  %v300_v45 = vpop.permute.xlu0 %299  ;;  %v393_v24 = vadd.f32 %v361_v14, %v193_v16  ;;  %v394_v46 = vadd.f32 %v362_v0, %v194_v4 }
 0x164   :  { %vm331_vm13 = vcmp.eq.s32.totalorder %v1568_v38, %v300_v45 }
 0x165   :  { %v801_v52 = vpack.c.bf16 %v774_v32, %v773_v31 }
 0x166   :  { %v248_v22 = vpop.permute.xlu2 %247 }
 0x167   :  { %v869_v54 = vunpack.c.l.b16 %v801_v52  ;;  %v870_v58 = vunpack.c.h.b16 %v801_v52  ;;  %vm316_vm0 = vcmp.eq.s32.totalorder %v1573_v40, %v248_v22 }
 0x16e   :  { %v687_v17 = vpop.permute.xlu1 %686  ;;  %v2009_v42 = vpop.permute.xlu2 %499 }
 0x16f   :  { %vm727_vm11 = vcmp.eq.s32.totalorder %v1568_v38, %v687_v17  ;;  %vm728_vm12 = vcmp.eq.s32.totalorder %v1573_v40, %v687_v17  ;;  %vm532_vm7 = vcmp.eq.s32.totalorder %v1573_v40, %v2009_v42 }
 0x170   :  { %v759_v36 = vsel %vm727_vm11, 1.0, %v1432_v43  ;;  %v760_v41 = vsel %vm728_vm12, 1.0, %v1432_v43  ;;  %vm513_vm11 = vcmp.eq.s32.totalorder %v1568_v38, %v442_v34  ;;  %vm514_vm12 = vcmp.eq.s32.totalorder %v1573_v40, %v442_v34 }
 0x171   :  { %v791_v60 = vadd.f32 %v759_v36, %v591_v18  ;;  %v792_v25 = vadd.f32 %v760_v41, %v592_v19  ;;  %v545_v17 = vsel %vm513_vm11, 1.0, %v1432_v43  ;;  %v546_v18 = vsel %vm514_vm12, 1.0, %v1432_v43 }
 0x172   :  { %v348_v36 = vsel %vm316_vm0, 1.0, %v1432_v43  ;;  %v363_v41 = vsel %vm331_vm13, 1.0, %v1432_v43  ;;  %v564_v59 = vsel %vm532_vm7, 1.0, %v1432_v43  ;;  %vm1137_vm0 = vcmask 392192  }
 0x173   :  { %v810_v35 = vpack.c.bf16 %v792_v25, %v791_v60  ;;  %v380_v1 = vadd.f32 %v348_v36, %v180_v12  ;;  %vm1257_vm7 = vcmask 1047559  }
 0x175   :  { %v887_v53 = vunpack.c.l.b16 %v810_v35  ;;  %v888_v63 = vunpack.c.h.b16 %v810_v35  ;;  %v648_v60 = vpop.permute.xlu0 %647 }
 0x176   :  { %v635_v27 = vpop.permute.xlu1 %634  ;;  %vm715_vm8 = vcmp.eq.s32.totalorder %v1568_v38, %v648_v60  ;;  %vm716_vm9 = vcmp.eq.s32.totalorder %v1573_v40, %v648_v60 }
 0x177   :  { %vm711_vm14 = vcmp.eq.s32.totalorder %v1568_v38, %v635_v27  ;;  %vm712_vm15 = vcmp.eq.s32.totalorder %v1573_v40, %v635_v27  ;;  %v905_v57 = vpack.c.b16 %v887_v53, %v885_v23  ;;  %v906_v28 = vpack.c.b16 %v888_v63, %v886_v39 }
 0x178   :  { %v743_v13 = vsel %vm711_vm14, 1.0, %v1432_v43  ;;  %v744_v44 = vsel %vm712_vm15, 1.0, %v1432_v43  ;;  %vm332_vm14 = vcmp.eq.s32.totalorder %v1573_v40, %v300_v45  ;;  %vm315_vm15 = vcmp.eq.s32.totalorder %v1568_v38, %v248_v22 }
 0x179   :  { %v775_v30 = vadd.f32 %v743_v13, %v575_v9  ;;  %v776_v47 = vadd.f32 %v744_v44, %v576_v56  ;;  %1059 = vmatmul.bf16.gmra.mxu2 %v905_v57  ;;  %1108 = vmatmul.bf16.gmra.mxu3 %v906_v28  ;;  %v347_v19 = vsel %vm315_vm15, 1.0, %v1432_v43  ;;  %v364_v21 = vsel %vm332_vm14, 1.0, %v1432_v43 }
 0x17a   :  { %v379_v29 = vadd.f32 %v347_v19, %v179_v8  ;;  %v747_v9 = vsel %vm715_vm8, 1.0, %v1432_v43  ;;  %v748_v56 = vsel %vm716_vm9, 1.0, %v1432_v43  ;;  %v196_v44 = vsel %vm164_vm1, 1.0, %v1432_v43 }
 0x17b   :  { %v802_v48 = vpack.c.bf16 %v776_v47, %v775_v30  ;;  %vm1239_vm1 = vcmask 1041409  }
 0x17d   :  { %v871_v49 = vunpack.c.l.b16 %v802_v48  ;;  %v872_v61 = vunpack.c.h.b16 %v802_v48 }
 0x17e   :  { %v2011_v6 = vpop.permute.xlu2 %693 }
 0x17f   :  { %v897_v62 = vpack.c.b16 %v871_v49, %v869_v54  ;;  %v898_v5 = vpack.c.b16 %v872_v61, %v870_v58  ;;  %vm729_vm10 = vcmp.eq.s32.totalorder %v1568_v38, %v2011_v6  ;;  %vm730_vm11 = vcmp.eq.s32.totalorder %v1573_v40, %v2011_v6 }
 0x180   :  { %v761_v47 = vsel %vm729_vm10, 1.0, %v1432_v43  ;;  %v762_v52 = vsel %vm730_vm11, 1.0, %v1432_v43  ;;  %v395_v49 = vadd.f32 %v363_v41, %v2030_v37  ;;  %v396_v58 = vadd.f32 %v364_v21, %v196_v44 }
 0x181   :  { %1039 = vmatmul.bf16.gmra.mxu0 %v897_v62  ;;  %1088 = vmatmul.bf16.gmra.mxu1 %v898_v5 }
 0x186   :  { %v242_v7 = vpop.permute.xlu1 %241  ;;  %v642_v51 = vpop.permute.xlu2 %641 }
 0x187   :  { %vm313_vm5 = vcmp.eq.s32.totalorder %v1568_v38, %v242_v7  ;;  %vm314_vm6 = vcmp.eq.s32.totalorder %v1573_v40, %v242_v7  ;;  %vm713_vm2 = vcmp.eq.s32.totalorder %v1568_v38, %v642_v51  ;;  %vm714_vm3 = vcmp.eq.s32.totalorder %v1573_v40, %v642_v51 }
 0x188   :  { %v345_v55 = vsel %vm313_vm5, 1.0, %v1432_v43  ;;  %v346_v33 = vsel %vm314_vm6, 1.0, %v1432_v43  ;;  %v745_v2 = vsel %vm713_vm2, 1.0, %v1432_v43  ;;  %v746_v20 = vsel %vm714_vm3, 1.0, %v1432_v43 }
 0x189   :  { %v377_v15 = vadd.f32 %v345_v55, %v177_v50  ;;  %v378_v11 = vadd.f32 %v346_v33, %v178_v3  ;;  %vm531_vm6 = vcmp.eq.s32.totalorder %v1568_v38, %v2009_v42  ;;  %v596_v7 = vadd.f32 %v564_v59, %v396_v58 }
 0x18a   :  { %v563_v30 = vsel %vm531_vm6, 1.0, %v1432_v43  ;;  %vm1242_vm2 = vcmask 1042434   ;;  %vm1245_vm3 = vcmask 1043459   ;;  %vm1254_vm6 = vcmask 1046534  }
 0x18b   :  { %v577_v25 = vadd.f32 %v545_v17, %v377_v15  ;;  %v578_v26 = vadd.f32 %v546_v18, %v378_v11  ;;  %v595_v34 = vadd.f32 %v563_v30, %v395_v49 }
 0x18c   :  { %v1050_v19 = vpop.f32.mrf.mxu2  ;;  %v1099_v36 = vpop.f32.mrf.mxu3 }
 0x18d   :  { %v777_v31 = vadd.f32 %v745_v2, %v577_v25  ;;  %v778_v32 = vadd.f32 %v746_v20, %v578_v26 }
 0x18e   :  { %v494_v10 = vpop.permute.xlu1 %493 }
 0x18f   :  { %vm529_vm4 = vcmp.eq.s32.totalorder %v1568_v38, %v494_v10  ;;  %vm530_vm5 = vcmp.eq.s32.totalorder %v1573_v40, %v494_v10  ;;  %v803_v22 = vpack.c.bf16 %v778_v32, %v777_v31 }
 0x190   :  { %v561_v35 = vsel %vm529_vm4, 1.0, %v1432_v43  ;;  %v562_v23 = vsel %vm530_vm5, 1.0, %v1432_v43  ;;  %vm1248_vm4 = vcmask 1044484   ;;  %vm1251_vm5 = vcmask 1045509  }
 0x191   :  { %v593_v27 = vadd.f32 %v561_v35, %v393_v24  ;;  %v594_v57 = vadd.f32 %v562_v23, %v394_v46  ;;  %v873_v6 = vunpack.c.l.b16 %v803_v22  ;;  %v874_v50 = vunpack.c.h.b16 %v803_v22 }
 0x193   :  { %v793_v61 = vadd.f32 %v761_v47, %v593_v27  ;;  %v794_v62 = vadd.f32 %v762_v52, %v594_v57 }
 0x194   :  { %v1052_v24 = vpop.f32.mrf.mxu2  ;;  %v1101_v46 = vpop.f32.mrf.mxu3 }
 0x195   :  { %v811_v51 = vpack.c.bf16 %v794_v62, %v793_v61  ;;  %v1102_v47 = vadd.f32 %v1101_v46, %v1052_v24 }
 0x196   :  { %v1030_v4 = vpop.f32.mrf.mxu0 }
 0x197   :  { %v889_v0 = vunpack.c.l.b16 %v811_v51  ;;  %v890_v15 = vunpack.c.h.b16 %v811_v51 }
 0x19e   :  { %v448_v39 = vpop.permute.xlu1 %447  ;;  %v1032_v17 = vpop.f32.mrf.mxu0 }
 0x19f   :  { %vm515_vm12 = vcmp.eq.s32.totalorder %v1568_v38, %v448_v39  ;;  %vm516_vm13 = vcmp.eq.s32.totalorder %v1573_v40, %v448_v39 }
 0x1a0   :  { %v547_v53 = vsel %vm515_vm12, 1.0, %v1432_v43  ;;  %v548_v63 = vsel %vm516_vm13, 1.0, %v1432_v43 }
 0x1a1   :  { %v579_v28 = vadd.f32 %v547_v53, %v379_v29  ;;  %v580_v13 = vadd.f32 %v548_v63, %v380_v1 }
 0x1a3   :  { %v779_v48 = vadd.f32 %v747_v9, %v579_v28  ;;  %v780_v54 = vadd.f32 %v748_v56, %v580_v13  ;;  %v2116_v56 = vld [vmem:[%s2164_s2 + $0x8] sm:$0xff]  ;;  %v2122_v28 = vld [vmem:[%s2164_s2] sm:$0xff] }
 0x1a5   :  { %v804_v5 = vpack.c.bf16 %v780_v54, %v779_v48  ;;  %v1100_v48 = vadd.f32 %v1099_v36, %v1050_v19 }
 0x1a6   :  { %v700_v8 = vpop.permute.xlu1 %699 }
 0x1a7   :  { %vm731_vm14 = vcmp.eq.s32.totalorder %v1568_v38, %v700_v8  ;;  %vm732_vm15 = vcmp.eq.s32.totalorder %v1573_v40, %v700_v8  ;;  %v875_v45 = vunpack.c.l.b16 %v804_v5  ;;  %v876_v3 = vunpack.c.h.b16 %v804_v5 }
 0x1a8   :  { %v763_v42 = vsel %vm731_vm14, 1.0, %v1432_v43  ;;  %v764_v12 = vsel %vm732_vm15, 1.0, %v1432_v43  ;;  %v1079_v43 = vpop.f32.mrf.mxu1 }
 0x1a9   :  { %v795_v37 = vadd.f32 %v763_v42, %v595_v34  ;;  %v796_v55 = vadd.f32 %v764_v12, %v596_v7  ;;  %v899_v33 = vpack.c.b16 %v875_v45, %v873_v6  ;;  %v900_v10 = vpack.c.b16 %v876_v3, %v874_v50 }
 0x1aa   :  { %v1080_v59 = vadd.f32 %v1079_v43, %v1030_v4  ;;  %v1130_v34 = vadd.f32 %v2116_v56, %v1102_v47  ;;  %v1129_v12 = vadd.f32 %v2122_v28, %v1100_v48 }
 0x1ab   :  { %v812_v14 = vpack.c.bf16 %v796_v55, %v795_v37  ;;  %1044 = vmatmul.bf16.gmra.mxu0 %v899_v33  ;;  %1093 = vmatmul.bf16.gmra.mxu1 %v900_v10 }
 0x1ac   :  { %v1121_v6 = vadd.f32 %v2122_v28, %v1080_v59  ;;  %v1175_v55 = vsel %vm1137_vm0, %v1130_v34, -inf }
 0x1ad   :  { %v891_v38 = vunpack.c.l.b16 %v812_v14  ;;  %v892_v40 = vunpack.c.h.b16 %v812_v14 }
 0x1ae   :  { %v1138_v10 = vsel %vm1137_vm0, %v1121_v6, -inf }
 0x1af   :  { %v907_v11 = vpack.c.b16 %v891_v38, %v889_v0  ;;  %v908_v16 = vpack.c.b16 %v892_v40, %v890_v15  ;;  %v1174_v38 = vsel %vm1137_vm0, %v1129_v12, -inf }
 0x1b0   :  { %v1081_v18 = vpop.f32.mrf.mxu1 }
 0x1b1   :  { %1064 = vmatmul.bf16.gmra.mxu2 %v907_v11  ;;  %1113 = vmatmul.bf16.gmra.mxu3 %v908_v16  ;;  %v1082_v44 = vadd.f32 %v1081_v18, %v1032_v17  ;;  %v1176_v16 = vmax.f32 %v1174_v38, %v1175_v55 }
 0x1b3   :  { %v1122_v49 = vadd.f32 %v2116_v56, %v1082_v44  ;;  %v1177_v46 = vrot.slane %v1176_v16, 4 }
 0x1b5   :  { %v1139_v3 = vsel %vm1137_vm0, %v1122_v49, -inf }
 0x1b6   :  { %v1140_v15 = vmax.f32 %v1138_v10, %v1139_v3 }
 0x1bc   :  { %v1055_v26 = vpop.f32.mrf.mxu2  ;;  %v1104_v29 = vpop.f32.mrf.mxu3 }
 0x1bd   :  { %v1105_v45 = vadd.f32 %v1104_v29, %v1055_v26 }
 0x1bf   :  { %v1131_v14 = vadd.f32 %v2122_v28, %v1105_v45 }
 0x1c1   :  { %v1183_v19 = vsel %vm1137_vm0, %v1131_v14, -inf }
 0x1c4   :  { %v1057_v20 = vpop.f32.mrf.mxu2  ;;  %v1106_v35 = vpop.f32.mrf.mxu3 }
 0x1c5   :  { %v1107_v58 = vadd.f32 %v1106_v35, %v1057_v20 }
 0x1c6   :  { %v1035_v41 = vpop.f32.mrf.mxu0  ;;  %v1084_v21 = vpop.f32.mrf.mxu1 }
 0x1c7   :  { %v1085_v9 = vadd.f32 %v1084_v21, %v1035_v41  ;;  %v1132_v37 = vadd.f32 %v2116_v56, %v1107_v58  ;;  %v1141_v41 = vrot.slane %v1140_v15, 4 }
 0x1c9   :  { %v1123_v30 = vadd.f32 %v2122_v28, %v1085_v9  ;;  %v1184_v4 = vsel %vm1137_vm0, %v1132_v37, -inf }
 0x1ca   :  { %v1185_v21 = vmax.f32 %v1183_v19, %v1184_v4 }
 0x1cb   :  { %v1147_v61 = vsel %vm1137_vm0, %v1123_v30, -inf }
 0x1cc   :  { %v1186_v20 = vrot.slane %v1185_v21, 4 }
 0x1ce   :  { %v1037_v60 = vpop.f32.mrf.mxu0  ;;  %v1086_v25 = vpop.f32.mrf.mxu1 }
 0x1cf   :  { %v1087_v31 = vadd.f32 %v1086_v25, %v1037_v60 }
 0x1d1   :  { %v1124_v57 = vadd.f32 %v2116_v56, %v1087_v31 }
 0x1d3   :  { %v1148_v22 = vsel %vm1137_vm0, %v1124_v57, -inf  ;;  %v1187_v57 = vmax.f32 %v1185_v21, %v1186_v20 }
 0x1d4   :  { %v1149_v7 = vmax.f32 %v1147_v61, %v1148_v22 }
 0x1d5   :  { %v1188_v61 = vrot.slane %v1187_v57, 2 }
 0x1d6   :  { %v1150_v33 = vrot.slane %v1149_v7, 4 }
 0x1d8   :  { %v1151_v17 = vmax.f32 %v1149_v7, %v1150_v33 }
 0x1da   :  { %v1152_v60 = vrot.slane %v1151_v17, 2 }
 0x1dc   :  { %v1153_v31 = vmax.f32 %v1151_v17, %v1152_v60 }
 0x1fc   :  { %v1060_v32 = vpop.f32.mrf.mxu2  ;;  %v1109_v53 = vpop.f32.mrf.mxu3 }
 0x1fd   :  { %v1110_v51 = vadd.f32 %v1109_v53, %v1060_v32 }
 0x1fe   :  { %v1040_v1 = vpop.f32.mrf.mxu0  ;;  %v1089_v2 = vpop.f32.mrf.mxu1 }
 0x1ff   :  { %v1090_v27 = vadd.f32 %v1089_v2, %v1040_v1  ;;  %v1133_v18 = vadd.f32 %v2122_v28, %v1110_v51  ;;  %v1142_v2 = vmax.f32 %v1140_v15, %v1141_v41 }
 0x201   :  { %v1125_v52 = vadd.f32 %v2122_v28, %v1090_v27  ;;  %v1192_v25 = vsel %vm1137_vm0, %v1133_v18, -inf  ;;  %v1143_v27 = vrot.slane %v1142_v2, 2 }
 0x203   :  { %v1156_v8 = vsel %vm1137_vm0, %v1125_v52, -inf  ;;  %v1154_v52 = vrot.slane %v1153_v31, 1  ;;  %v1144_v58 = vmax.f32 %v1142_v2, %v1143_v27 }
 0x204   :  { %v1062_v62 = vpop.f32.mrf.mxu2  ;;  %v1111_v5 = vpop.f32.mrf.mxu3 }
 0x205   :  { %v1112_v50 = vadd.f32 %v1111_v5, %v1062_v62  ;;  %v1155_v7 = vmax.f32 %v1153_v31, %v1154_v52  ;;  %v1145_v12 = vrot.slane %v1144_v58, 1 }
 0x206   :  { %v1042_v23 = vpop.f32.mrf.mxu0  ;;  %v1091_v39 = vpop.f32.mrf.mxu1 }
 0x207   :  { %v1092_v63 = vadd.f32 %v1091_v39, %v1042_v23  ;;  %v1134_v40 = vadd.f32 %v2116_v56, %v1112_v50  ;;  %v1178_v23 = vmax.f32 %v1176_v16, %v1177_v46  ;;  %v1189_v50 = vmax.f32 %v1187_v57, %v1188_v61 }
 0x209   :  { %v1126_v13 = vadd.f32 %v2116_v56, %v1092_v63  ;;  %v1193_v24 = vsel %vm1137_vm0, %v1134_v40, -inf  ;;  %v1179_v47 = vrot.slane %v1178_v23, 2  ;;  %v1190_v16 = vrot.slane %v1189_v50, 1 }
 0x20a   :  { %v1194_v29 = vmax.f32 %v1192_v25, %v1193_v24 }
 0x20b   :  { %v1157_v54 = vsel %vm1137_vm0, %v1126_v13, -inf  ;;  %v1180_v62 = vmax.f32 %v1178_v23, %v1179_v47  ;;  %v1191_v46 = vmax.f32 %v1189_v50, %v1190_v16 }
 0x20c   :  { %v1158_v42 = vmax.f32 %v1156_v8, %v1157_v54  ;;  %v1195_v63 = vrot.slane %v1194_v29, 4 }
 0x20d   :  { %v1181_v55 = vrot.slane %v1180_v62, 1 }
 0x20e   :  { %v1159_v0 = vrot.slane %v1158_v42, 4  ;;  %v1196_v48 = vmax.f32 %v1194_v29, %v1195_v63 }
 0x20f   :  { %v1182_v4 = vmax.f32 %v1180_v62, %v1181_v55 }
 0x210   :  { %v1160_v36 = vmax.f32 %v1158_v42, %v1159_v0  ;;  %v1197_v8 = vrot.slane %v1196_v48, 2  ;;  %v1405_v42 = vld [vmem:[%s2165_s3] ss:$0 sm:$0xff]  ;;  %s1433_s3 = smov [#allocation2]  }
 0x211   :  { %v1215_v14 = vadd.f32 %v1405_v42, %v1155_v7  ;;  %v1218_v25 = vadd.f32 %v1405_v42, %v1182_v4  ;;  %v1219_v23 = vadd.f32 %v1405_v42, %v1191_v46  ;;  %s1266_s13 = sshll.u32 %s1433_s3, 4  ;;  %s1267_s13 = int_to_ptr.vmem [resolvable:$true] %s1266_s13 }
 0x212   :  { %v1161_v1 = vrot.slane %v1160_v36, 2  ;;  %v1198_v0 = vmax.f32 %v1196_v48, %v1197_v8 }
 0x213   :  { %v1223_v19 = vmax.f32 %v1215_v14, 0.0  ;;  %v1226_v31 = vmax.f32 %v1218_v25, 0.0 }
 0x214   :  { %v1162_v9 = vmax.f32 %v1160_v36, %v1161_v1  ;;  %v1199_v41 = vrot.slane %v1198_v0, 1 }
 0x215   :  { %v1238_v29 = vrot.slane %v1223_v19, 7 }
 0x216   :  { %v1163_v54 = vrot.slane %v1162_v9, 1  ;;  %v1200_v1 = vmax.f32 %v1198_v0, %v1199_v41 }
 0x218   :  { %v1164_v6 = vmax.f32 %v1162_v9, %v1163_v54  ;;  %v1220_v9 = vadd.f32 %v1405_v42, %v1200_v1 }
 0x21a   :  { %v1216_v38 = vadd.f32 %v1405_v42, %v1164_v6  ;;  %v1228_v52 = vmax.f32 %v1220_v9, 0.0 }
 0x21c   :  { %v1224_v21 = vmax.f32 %v1216_v38, 0.0 }
 0x21e   :  { %v1241_v2 = vrot.slane %v1224_v21, 6 }
 0x228   :  { %v1045_v11 = vpop.f32.mrf.mxu0  ;;  %v1094_v43 = vpop.f32.mrf.mxu1 }
 0x229   :  { %v1095_v26 = vadd.f32 %v1094_v43, %v1045_v11  ;;  %v1146_v11 = vmax.f32 %v1144_v58, %v1145_v12  ;;  %v1253_v58 = vrot.slane %v1228_v52, 2 }
 0x22b   :  { %v1127_v32 = vadd.f32 %v2122_v28, %v1095_v26  ;;  %v1214_v24 = vadd.f32 %v1405_v42, %v1146_v11 }
 0x22d   :  { %v1165_v59 = vsel %vm1137_vm0, %v1127_v32, -inf }
 0x230   :  { %v1047_v35 = vpop.f32.mrf.mxu0  ;;  %v1096_v39 = vpop.f32.mrf.mxu1 }
 0x231   :  { %v1097_v53 = vadd.f32 %v1096_v39, %v1047_v35  ;;  %v1222_v35 = vmax.f32 %v1214_v24, 0.0 }
 0x233   :  { %v1128_v13 = vadd.f32 %v2116_v56, %v1097_v53  ;;  %v1240_v63 = vsel %vm1239_vm1, %v1238_v29, %v1222_v35 }
 0x234   :  { %v1065_v44 = vpop.f32.mrf.mxu2  ;;  %v1114_v30 = vpop.f32.mrf.mxu3  ;;  %v1243_v27 = vsel %vm1242_vm2, %v1241_v2, %v1240_v63 }
 0x235   :  { %v1166_v22 = vsel %vm1137_vm0, %v1128_v13, -inf  ;;  %v1115_v34 = vadd.f32 %v1114_v30, %v1065_v44  ;;  %v1227_v13 = vmax.f32 %v1219_v23, 0.0  ;;  %v1247_v30 = vrot.slane %v1226_v31, 4 }
 0x236   :  { %v1167_v49 = vmax.f32 %v1165_v59, %v1166_v22 }
 0x237   :  { %v1135_v51 = vadd.f32 %v2122_v28, %v1115_v34  ;;  %v1250_v48 = vrot.slane %v1227_v13, 3 }
 0x238   :  { %v1168_v5 = vrot.slane %v1167_v49, 4 }
 0x239   :  { %v1201_v17 = vsel %vm1137_vm0, %v1135_v51, -inf }
 0x23a   :  { %v1169_v45 = vmax.f32 %v1167_v49, %v1168_v5 }
 0x23c   :  { %v1067_v3 = vpop.f32.mrf.mxu2  ;;  %v1116_v37 = vpop.f32.mrf.mxu3  ;;  %v1170_v33 = vrot.slane %v1169_v45, 2 }
 0x23d   :  { %v1117_v10 = vadd.f32 %v1116_v37, %v1067_v3 }
 0x23e   :  { %v1171_v15 = vmax.f32 %v1169_v45, %v1170_v33 }
 0x23f   :  { %v1136_v40 = vadd.f32 %v2116_v56, %v1117_v10 }
 0x240   :  { %v1172_v43 = vrot.slane %v1171_v15, 1 }
 0x241   :  { %v1202_v18 = vsel %vm1137_vm0, %v1136_v40, -inf }
 0x242   :  { %v1203_v36 = vmax.f32 %v1201_v17, %v1202_v18  ;;  %v1173_v28 = vmax.f32 %v1171_v15, %v1172_v43 }
 0x244   :  { %v1204_v60 = vrot.slane %v1203_v36, 4  ;;  %v1217_v26 = vadd.f32 %v1405_v42, %v1173_v28 }
 0x246   :  { %v1205_v56 = vmax.f32 %v1203_v36, %v1204_v60  ;;  %v1225_v20 = vmax.f32 %v1217_v26, 0.0 }
 0x248   :  { %v1206_v39 = vrot.slane %v1205_v56, 2  ;;  %v1244_v32 = vrot.slane %v1225_v20, 5 }
 0x24a   :  { %v1207_v53 = vmax.f32 %v1205_v56, %v1206_v39  ;;  %v1246_v44 = vsel %vm1245_vm3, %v1244_v32, %v1243_v27 }
 0x24b   :  { %v1249_v59 = vsel %vm1248_vm4, %v1247_v30, %v1246_v44 }
 0x24c   :  { %v1208_v57 = vrot.slane %v1207_v53, 1  ;;  %v1252_v49 = vsel %vm1251_vm5, %v1250_v48, %v1249_v59 }
 0x24d   :  { %v1255_v62 = vsel %vm1254_vm6, %v1253_v58, %v1252_v49 }
 0x24e   :  { %v1209_v47 = vmax.f32 %v1207_v53, %v1208_v57 }
 0x250   :  { %v1221_v22 = vadd.f32 %v1405_v42, %v1209_v47 }
 0x252   :  { %v1229_v54 = vmax.f32 %v1221_v22, 0.0 }
 0x254   :  { %v1256_v61 = vrot.slane %v1229_v54, 1 }
 0x256   :  { %v1258_v5 = vsel %vm1257_vm7, %v1256_v61, %v1255_v62 }
 0x257   :  { %1260 = vst.msk [vmem:[#allocation2] sm:$0xff] %vm1137_vm0, %v1258_v5 }
 0x258   :  { %1271 = dma.vmem_to_hbm [thread:$0]  %s1267_s13, 128, %s1269_s16, [#allocation3]  }
 0x259   :  { %1430 = dma.done.wait [#allocation3], 128  }
 0x25a   :  { %1431 = vsyncadd [#allocation3], 4294967168 }
 0x25b   :  { %1276 = vsyncpa [#allocation3], 1 }

</bundles_post_ra>
